<compile_context>
chip_gen: v7x
topology: tpu7x:2x2x1
jax: 0.10.0
libtpu: 0.0.40
codegen_flags: <defaults>
</compile_context>

<pallas_src>
import functools
import math

import jax
import jax.numpy as jnp
from jax.experimental import pallas as pl
from jax.experimental.pallas import tpu as pltpu


def _mix_u32(x):
    """splitmix32-style finalizer on uint32 lanes (VPU int ops only)."""
    x = x ^ (x >> jnp.uint32(16))
    x = x * jnp.uint32(0x7FEB352D)
    x = x ^ (x >> jnp.uint32(15))
    x = x * jnp.uint32(0x846CA68B)
    x = x ^ (x >> jnp.uint32(16))
    return x


def _pe_dropout_kernel(seed_ref, x_ref, pe_ref, o_ref, *, p, training, ts):
    # x_ref: (TS, B, D), pe_ref: (TS, D) -> broadcast add over batch dim.
    x = x_ref[...].astype(jnp.float32)
    pe = pe_ref[...].astype(jnp.float32)
    y = x + pe[:, None, :]

    if training and p > 0.0:
        # Inverted dropout with a counter-based hash RNG:
        # per-element bits depend only on (seed, global element index), so the
        # mask is independent of the tile size / grid layout.
        # NOTE: randomness stream differs from torch's RNG (semantics identical).
        shape = y.shape  # (TS, B, D)
        row = jax.lax.broadcasted_iota(jnp.int32, shape, 0)
        col_b = jax.lax.broadcasted_iota(jnp.int32, shape, 1)
        col_d = jax.lax.broadcasted_iota(jnp.int32, shape, 2)
        grow = row + pl.program_id(0) * ts                      # global row
        idx = (grow * shape[1] + col_b) * shape[2] + col_d      # global index
        bits = idx.astype(jnp.uint32) * jnp.uint32(2654435761)
        bits = bits ^ seed_ref[0].astype(jnp.uint32)
        bits = _mix_u32(bits)
        # 31-bit integer threshold compare (no float-uniform construction).
        r31 = (bits >> jnp.uint32(1)).astype(jnp.int32)         # in [0, 2^31)
        thr = jnp.int32(min(int(round(p * (1 << 31))), (1 << 31) - 1))
        keep = r31 >= thr                                       # P(keep) = 1 - p
        y = jnp.where(keep, y * jnp.float32(1.0 / (1.0 - p)), jnp.float32(0.0))

    o_ref[...] = y.astype(o_ref.dtype)


def make_positional_encoding(max_len, d_model, dtype=jnp.float32):
    """Deterministic construction of the `pe` buffer, same math as the module."""
    position = jnp.arange(max_len, dtype=jnp.float32)[:, None]              # (L, 1)
    div_term = jnp.exp(
        jnp.arange(0, d_model, 2, dtype=jnp.float32) * (-math.log(10000.0) / d_model)
    )                                                                        # (D/2,)
    angles = position * div_term                                             # (L, D/2)
    pe = jnp.zeros((max_len, d_model), dtype=jnp.float32)
    pe = pe.at[:, 0::2].set(jnp.sin(angles))
    pe = pe.at[:, 1::2].set(jnp.cos(angles))
    # pe.unsqueeze(0).transpose(0, 1)  ->  (max_len, 1, d_model)
    return pe[:, None, :].astype(dtype)


def _pick_seq_tile(S, B, D, itemsize):
    """Block rows so one x block is ~4 MiB (double-buffered x + out + pe stays
    well under v7x's 64 MiB VMEM / default scoped limit)."""
    target_bytes = 4 * 1024 * 1024
    row_bytes = max(B * D * itemsize, 1)
    ts = max(1, target_bytes // row_bytes)
    if ts >= S:
        return S
    return max(8, (ts // 8) * 8)   # keep second-to-last block dim (8,...)-friendly


def positional_encoding_forward(x, pe, *, p=0.1, training=False, seed=0):
    """x: (S, B, D); pe: (max_len, 1, D). Returns dropout(x + pe[:S])."""
    S, B, D = x.shape
    pe_s = pe[:S, 0, :]                              # (S, D): squeezed, f32
    seed_arr = jnp.array([seed], dtype=jnp.int32)

    ts = _pick_seq_tile(S, B, D, x.dtype.itemsize)
    grid = (pl.cdiv(S, ts),)

    kernel = functools.partial(
        _pe_dropout_kernel, p=float(p), training=bool(training), ts=ts
    )

    return pl.pallas_call(
        kernel,
        out_shape=jax.ShapeDtypeStruct(x.shape, x.dtype),
        grid_spec=pltpu.PrefetchScalarGridSpec(
            num_scalar_prefetch=1,                    # seed lands in SMEM
            grid=grid,
            in_specs=[
                pl.BlockSpec((ts, B, D), lambda s, seed_ref: (s, 0, 0)),  # x
                pl.BlockSpec((ts, D), lambda s, seed_ref: (s, 0)),        # pe[:S]
            ],
            out_specs=pl.BlockSpec((ts, B, D), lambda s, seed_ref: (s, 0, 0)),
        ),
        compiler_params=pltpu.CompilerParams(
            dimension_semantics=("parallel",),        # shard S across TCs on v7x
        ),
    )(seed_arr, x, pe_s)


if __name__ == "__main__":
    d_model = 4
    seq_len = 8
    batch = 2
    max_len = 5000

    key = jax.random.PRNGKey(0)
    x = jax.random.normal(key, (seq_len, batch, d_model), dtype=jnp.float32)

    pe = make_positional_encoding(max_len, d_model)

    # Eval-mode forward (dropout = identity), matching module.eval() semantics.
    out = positional_encoding_forward(x, pe, p=0.1, training=False)
    out = jax.block_until_ready(out)

    # Correctness check vs pure-JAX reference of the PyTorch forward (eval).
    ref = x + pe[:seq_len]
    assert out.shape == x.shape and out.dtype == x.dtype
    assert jnp.allclose(out, ref, atol=1e-6), "mismatch vs reference"

    # Also exercise the training-mode (dropout) path once.
    out_train = positional_encoding_forward(x, pe, p=0.1, training=True, seed=123)
    out_train = jax.block_until_ready(out_train)
    assert out_train.shape == x.shape

    print("KERNEL_OK")
</pallas_src>

<mosaic_0001>
module attributes {stable_mosaic.version = 11 : i64} {
  func.func @_pe_dropout_kernel(%arg0: i32, %arg1: memref<1xi32, #tpu.memory_space<smem>>, %arg2: memref<8x2x4xf32, #tpu.memory_space<vmem>>, %arg3: memref<8x4xf32, #tpu.memory_space<vmem>>, %arg4: memref<8x2x4xf32, #tpu.memory_space<vmem>>) attributes {dimension_semantics = [#tpu.dimension_semantics<parallel>], iteration_bounds = array<i64: 1>, scalar_prefetch = 1 : i64, scratch_operands = 0 : i64, tpu.core_type = #tpu.core_type<tc>, window_params = [{transform_indices = @transform_0, window_bounds = array<i64: 8, 2, 4>}, {transform_indices = @transform_1, window_bounds = array<i64: 8, 4>}, {transform_indices = @transform_2, window_bounds = array<i64: 8, 2, 4>}]} {
    %c0 = arith.constant 0 : index
    %c0_0 = arith.constant 0 : index
    %c0_1 = arith.constant 0 : index
    %0 = vector.load %arg2[%c0, %c0_0, %c0_1] : memref<8x2x4xf32, #tpu.memory_space<vmem>>, vector<8x2x4xf32>
    %c0_2 = arith.constant 0 : index
    %c0_3 = arith.constant 0 : index
    %1 = vector.load %arg3[%c0_2, %c0_3] : memref<8x4xf32, #tpu.memory_space<vmem>>, vector<8x4xf32>
    %2 = vector.shape_cast %1 : vector<8x4xf32> to vector<8x1x4xf32>
    %3 = vector.broadcast %2 : vector<8x1x4xf32> to vector<8x2x4xf32>
    %4 = arith.addf %0, %3 : vector<8x2x4xf32>
    %c0_4 = arith.constant 0 : index
    %c0_5 = arith.constant 0 : index
    %c0_6 = arith.constant 0 : index
    %5 = vector.load %arg4[%c0_4, %c0_5, %c0_6] : memref<8x2x4xf32, #tpu.memory_space<vmem>>, vector<8x2x4xf32>
    tpu.vector_store %arg4[%c0_4, %c0_5, %c0_6], %4 {strides = array<i32>} : memref<8x2x4xf32, #tpu.memory_space<vmem>>, vector<8x2x4xf32>,
    return
  }
  func.func @transform_0(%arg0: i32, %arg1: memref<1xi32, #tpu.memory_space<smem>>) -> (i32, i32, i32) {
    %c0_i32 = arith.constant 0 : i32
    %c0_i32_0 = arith.constant 0 : i32
    %c0_i32_1 = arith.constant 0 : i32
    return %arg0, %c0_i32, %c0_i32_0 : i32, i32, i32
  }
  func.func @transform_1(%arg0: i32, %arg1: memref<1xi32, #tpu.memory_space<smem>>) -> (i32, i32) {
    %c0_i32 = arith.constant 0 : i32
    %c0_i32_0 = arith.constant 0 : i32
    return %arg0, %c0_i32 : i32, i32
  }
  func.func @transform_2(%arg0: i32, %arg1: memref<1xi32, #tpu.memory_space<smem>>) -> (i32, i32, i32) {
    %c0_i32 = arith.constant 0 : i32
    %c0_i32_0 = arith.constant 0 : i32
    %c0_i32_1 = arith.constant 0 : i32
    return %arg0, %c0_i32, %c0_i32_0 : i32, i32, i32
  }
}

</mosaic_0001>

<bundles_post_ra>
// kernel: tpu_custom_call.1
= control target key start
LH: loop header
LB: loop body
LE: loop exit
PB: predicated region body
PF: predicated region fallthrough
CT: control target
= control target key end

     0   :  { %v27_v0 = vlaneseq  ;;  %v134_v2 = vmov 1966171168   ;;  %vm120_vm0 = vcmask 25600   ;;  %s214_s0 = inlined_call_operand.<no memory space> [shape: s32[1], index: 0, kind: input, shape index: {}]   ;;  %s215_s2 = inlined_call_operand.vmem [shape: f32[8,4], index: 2, kind: input, shape index: {}]   ;;  %s216_s1 = inlined_call_operand.vmem [shape: f32[8,2,4], index: 1, kind: input, shape index: {}]   ;;  %s217_s3 = inlined_call_operand.vmem [shape: f32[8,2,4], index: 3, kind: output, shape index: {}]  }
   0x1   :  { %v21_v1 = vld [vmem:[%s215_s2] sm:$0xff]  ;;  %v25_v3 = vunpack.c.l.s4 %v134_v2  ;;  %v17_v19 = vld [vmem:[%s216_s1 + $0x8] sm:$0x3]  ;;  %v18_v29 = vld [vmem:[%s216_s1 + $0xa] sm:$0x3] }
   0x2   :  { %v28_v4 = vshrl.u32 %v27_v0, 7  ;;  %v23_v6 = vcombine.high %v21_v1, %v21_v1  ;;  %v13_v15 = vld [vmem:[%s216_s1] sm:$0x3]  ;;  %v14_v21 = vld [vmem:[%s216_s1 + $0x2] sm:$0x3] }
   0x3   :  { %v26_v5 = vunpack.c.0.s8 %v25_v3  ;;  %v15_v22 = vld [vmem:[%s216_s1 + $0x4] sm:$0x3]  ;;  %v19_v30 = vld [vmem:[%s216_s1 + $0xc] sm:$0x3]  ;;  %v16_v31 = vld [vmem:[%s216_s1 + $0x6] sm:$0x3] }
   0x4   :  { %v74_v9 = vsub.s32 0, %v28_v4  ;;  %v20_v39 = vld [vmem:[%s216_s1 + $0xe] sm:$0x3] }
   0x5   :  { %v29_v7 = vsub.s32 %v26_v5, %v28_v4 }
   0x7   :  { %v30_v8 = vrot.slane %v21_v1, %v29_v7  ;;  %v37_v10 = vrot.slane %v23_v6, %v29_v7 }
   0x9   :  { %v46_v11 = vrot.slane %v30_v8, %v29_v7  ;;  %v38_v12 = vcombine.high %v30_v8, %v30_v8  ;;  %v53_v13 = vrot.slane %v37_v10, %v29_v7  ;;  %v39_v14 = vcombine.high %v37_v10, %v37_v10 }
   0xb   :  { %v75_v16 = vrot.slane %v46_v11, %v74_v9  ;;  %v60_v17 = vrot.slane %v38_v12, %v29_v7  ;;  %v68_v18 = vcombine.high %v46_v11, %v46_v11  ;;  %v91_v20 = vrot.slane %v53_v13, %v74_v9 }
   0xc   :  { %v67_v23 = vrot.slane %v39_v14, %v29_v7  ;;  %v69_v24 = vcombine.high %v53_v13, %v53_v13 }
   0xd   :  { %v112_v25 = vadd.f32 %v75_v16, %v13_v15  ;;  %v79_v26 = vrot.slane %v60_v17, %v74_v9  ;;  %v83_v27 = vrot.slane %v68_v18, %v74_v9  ;;  %v70_v28 = vcombine.high %v60_v17, %v60_v17 }
   0xe   :  { %v116_v32 = vadd.f32 %v91_v20, %v17_v19  ;;  %v95_v33 = vrot.slane %v67_v23, %v74_v9  ;;  %v99_v34 = vrot.slane %v69_v24, %v74_v9  ;;  %v71_v35 = vcombine.high %v67_v23, %v67_v23 }
   0xf   :  { %121 = vst.msk [vmem:[%s217_s3] sm:$0x3] %vm120_vm0, %v112_v25  ;;  %v113_v36 = vadd.f32 %v79_v26, %v14_v21  ;;  %v114_v37 = vadd.f32 %v83_v27, %v15_v22  ;;  %v87_v38 = vrot.slane %v70_v28, %v74_v9 }
  0x10   :  { %125 = vst.msk [vmem:[%s217_s3 + $0x8] sm:$0x3] %vm120_vm0, %v116_v32  ;;  %v117_v40 = vadd.f32 %v95_v33, %v18_v29  ;;  %v118_v41 = vadd.f32 %v99_v34, %v19_v30  ;;  %v103_v42 = vrot.slane %v71_v35, %v74_v9 }
  0x11   :  { %122 = vst.msk [vmem:[%s217_s3 + $0x2] sm:$0x3] %vm120_vm0, %v113_v36  ;;  %123 = vst.msk [vmem:[%s217_s3 + $0x4] sm:$0x3] %vm120_vm0, %v114_v37  ;;  %v115_v43 = vadd.f32 %v87_v38, %v16_v31 }
  0x12   :  { %126 = vst.msk [vmem:[%s217_s3 + $0xa] sm:$0x3] %vm120_vm0, %v117_v40  ;;  %127 = vst.msk [vmem:[%s217_s3 + $0xc] sm:$0x3] %vm120_vm0, %v118_v41  ;;  %v119_v44 = vadd.f32 %v103_v42, %v20_v39 }
  0x13   :  { %124 = vst.msk [vmem:[%s217_s3 + $0x6] sm:$0x3] %vm120_vm0, %v115_v43 }
  0x14   :  { %128 = vst.msk [vmem:[%s217_s3 + $0xe] sm:$0x3] %vm120_vm0, %v119_v44 }

</bundles_post_ra>
